<compile_context>
chip_gen: v6e
topology: v6e:2x2x1
jax: 0.10.0
libtpu: 0.0.40
codegen_flags: <defaults>
</compile_context>

<pallas_src>
import functools

import jax
import jax.numpy as jnp
from jax.experimental import pallas as pl
from jax.experimental.pallas import tpu as pltpu

TAU = 2.0          # spikingjelly default
V_TH = 1.0
V_RESET = 0.0

_LANE = 128
_SUBLANE = 8


def _round_up(x, m):
    return -(-x // m) * m


def _pick_tile(dim, cap, align):
    """Largest tile <= cap that divides `dim` (full dim if dim <= cap).

    The tile is kept a multiple of `align` so the (8,128) layout stays legal;
    raises instead of silently degrading to tiny (1/8-wide) tiles.
    """
    if dim <= cap:
        return dim
    t = (cap // align) * align
    while t >= align and dim % t:
        t -= align
    if t < align or dim % t:
        raise ValueError(
            f"dim={dim} has no divisor that is a multiple of {align} and <= {cap}; "
            "pad the array or adjust the tile caps.")
    return t


def _pad_axis(x, axis, new_size):
    pad = new_size - x.shape[axis]
    if pad == 0:
        return x
    widths = [(0, 0)] * x.ndim
    widths[axis] = (0, pad)
    return jnp.pad(x, widths)


# ---------------------------------------------------------------------------
# Stage 1: hoisted img_fc1  (h1 = x @ W1 + b1 over M = T*B rows, K-tiled)
# ---------------------------------------------------------------------------
def _fc1_matmul_kernel(x_ref, w_ref, b_ref, o_ref, acc_ref, *, tk):
    k = pl.program_id(2)

    @pl.when(k == 0)
    def _init():
        acc_ref[...] = jnp.zeros_like(acc_ref)

    # x holds the full-K strip (resident across the j/k sweeps); slice the
    # current K-chunk out of VMEM instead of re-streaming it from HBM.
    k0 = pl.multiple_of(k * tk, tk)
    acc_ref[...] += jnp.dot(x_ref[:, pl.ds(k0, tk)], w_ref[...],
                            preferred_element_type=jnp.float32)

    @pl.when(k == pl.num_programs(2) - 1)
    def _finalize():
        o_ref[...] = acc_ref[...] + b_ref[...]


def _fc1_matmul(x_bf16, w_bf16, b_f32):
    """x: [M, K] bf16, w: [K, N] bf16, b: [1, N] f32  ->  [M, N] f32."""
    M, K = x_bf16.shape
    _, N = w_bf16.shape

    # Large tiles: tm caps the resident x strip (~12.8 MiB at K=25088);
    # tn/tk sized so W1 DMAs are multi-MiB (>=85% of HBM roofline territory)
    # while the double-buffered working set stays under ~48 MiB (v7x VMEM=64).
    tm = _pick_tile(M, 256, _SUBLANE)
    tn = _pick_tile(N, 512, _LANE)
    tk = _pick_tile(K, 3584, _LANE)

    # Explicit scoped-VMEM budget (defaults: 16 MiB v5e / 32 MiB v6e,v7x).
    ws = (2 * tm * K * 2          # x strip, bf16, double-buffered
          + 2 * tk * tn * 2       # W1 tile, bf16, double-buffered
          + 2 * tn * 4            # bias tile
          + 2 * tm * tn * 4       # output tile, f32, double-buffered
          + tm * tn * 4)          # f32 accumulator scratch
    vmem_limit = min(max(int(ws * 1.3) + (2 << 20), 32 << 20), 60 << 20)

    grid_spec = pltpu.PrefetchScalarGridSpec(
        num_scalar_prefetch=0,
        grid=(M // tm, N // tn, K // tk),
        in_specs=[
            # Full-K activation strip; index_map ignores (j, k) so it is only
            # re-DMAed when the M-tile changes.
            pl.BlockSpec((tm, K), lambda i, j, k: (i, 0)),
            pl.BlockSpec((tk, tn), lambda i, j, k: (k, j)),
            pl.BlockSpec((1, tn), lambda i, j, k: (0, j)),
        ],
        out_specs=pl.BlockSpec((tm, tn), lambda i, j, k: (i, j)),
        scratch_shapes=[pltpu.VMEM((tm, tn), jnp.float32)],
    )
    return pl.pallas_call(
        functools.partial(_fc1_matmul_kernel, tk=tk),
        out_shape=jax.ShapeDtypeStruct((M, N), jnp.float32),
        grid_spec=grid_spec,
        compiler_params=pltpu.CompilerParams(
            dimension_semantics=("parallel", "parallel", "arbitrary"),
            vmem_limit_bytes=vmem_limit,
        ),
    )(x_bf16, w_bf16, b_f32)


# ---------------------------------------------------------------------------
# Stage 2: recurrent LIF chain over time (Tc timesteps per grid step)
# ---------------------------------------------------------------------------
def _lif_step(v_ref, x):
    """One LIF update (tau=2, decay_input=True, hard reset). Mutates v_ref."""
    v = (v_ref[...] + x) * 0.5           # v + (x - v)/tau with tau == 2
    fired = v >= V_TH
    v_ref[...] = jnp.where(fired, V_RESET, v)
    return fired.astype(jnp.float32)


def _fusenet_recurrent_kernel(h1_ref, aud_ref, w2_ref, b2_ref,
                              w3i_ref, w3a_ref, b3_ref,
                              out_ref,
                              v1_ref, v2_ref, v3_ref, acc_ref,
                              *, t_chunk, inv_t):
    tc = pl.program_id(0)

    @pl.when(tc == 0)
    def _init():
        v1_ref[...] = jnp.zeros_like(v1_ref)
        v2_ref[...] = jnp.zeros_like(v2_ref)
        v3_ref[...] = jnp.zeros_like(v3_ref)
        acc_ref[...] = jnp.zeros_like(acc_ref)

    # Hoist weight loads out of the unrolled time loop.
    w2 = w2_ref[...]
    b2 = b2_ref[...]
    w3i = w3i_ref[...]
    w3a = w3a_ref[...]
    b3 = b3_ref[...]

    def step(t, carry):
        # neuron1 on the precomputed (hoisted) fc1 activations
        s1 = _lif_step(v1_ref, h1_ref[t])
        # img_fc2 + neuron2  (spikes are exactly 0/1 -> lossless bf16 operand)
        h2 = jnp.dot(s1.astype(jnp.bfloat16), w2,
                     preferred_element_type=jnp.float32) + b2
        s2 = _lif_step(v2_ref, h2)
        # fuse_fc on cat((img_spikes, audio), -1), as an exact split matmul
        h3 = (jnp.dot(s2.astype(jnp.bfloat16), w3i,
                      preferred_element_type=jnp.float32)
              + jnp.dot(aud_ref[t], w3a,
                        preferred_element_type=jnp.float32)
              + b3)
        s3 = _lif_step(v3_ref, h3)
        # out.mean(0): accumulate spikes; scale by the static 1/T at the end.
        acc_ref[...] += s3
        return carry

    jax.lax.fori_loop(0, t_chunk, step, 0, unroll=True)

    @pl.when(tc == pl.num_programs(0) - 1)
    def _finalize():
        out_ref[...] = acc_ref[...] * inv_t


def fusenet_forward(img, audio, params):
    """img: [T, B, D_IMG] f32; audio: [T, B, ...] f32 (flattened per (t, b))."""
    T, B, d_img = img.shape
    audio_flat = audio.reshape(T, B, -1)          # layer.Flatten per time step
    d_aud = audio_flat.shape[-1]

    w1, b1, w2, b2, w3, b3 = params               # weights stored [in, out]
    h1_dim = w1.shape[1]
    h2_dim = w2.shape[1]
    d_out = w3.shape[1]
    assert w3.shape[0] == h2_dim + d_aud

    # Lane-dense padding of the narrow fuse dims.  Exact: padded W2 columns /
    # biases are zero, so padded LIF2/LIF3 neurons never cross V_TH=1 and the
    # padded W3 rows/columns contribute exactly 0.
    h2_pad = _round_up(h2_dim, _LANE)
    d_out_pad = _round_up(d_out, _LANE)

    # bf16 operands for the MXU; biases / membrane state / accumulation in f32.
    img_bf = img.astype(jnp.bfloat16)
    aud_bf = audio_flat.astype(jnp.bfloat16)
    w1_bf = w1.astype(jnp.bfloat16)
    w2_bf = _pad_axis(w2.astype(jnp.bfloat16), 1, h2_pad)                    # (H1, H2p)
    b2_p = _pad_axis(b2.astype(jnp.float32).reshape(1, -1), 1, h2_pad)       # (1, H2p)
    w3_bf = w3.astype(jnp.bfloat16)
    w3_img = _pad_axis(_pad_axis(w3_bf[:h2_dim], 0, h2_pad), 1, d_out_pad)   # (H2p, Dp)
    w3_aud = _pad_axis(w3_bf[h2_dim:], 1, d_out_pad)                         # (D_AUD, Dp)
    b3_p = _pad_axis(b3.astype(jnp.float32).reshape(1, -1), 1, d_out_pad)    # (1, Dp)

    # ---- Stage 1: hoisted fc1 over M = T*B rows ----
    h1 = _fc1_matmul(img_bf.reshape(T * B, d_img), w1_bf,
                     b1.reshape(1, h1_dim).astype(jnp.float32))
    # TODO(synk): emit h1 in bf16 (halves the largest inter-stage HBM traffic)
    # once spike-rate parity vs the f32 intermediate has been validated.
    h1 = h1.reshape(T, B, h1_dim)

    # ---- Stage 2: recurrent LIF chain, Tc timesteps per grid step ----
    t_chunk = min(T, 8)
    while T % t_chunk:
        t_chunk -= 1

    full = lambda shape: pl.BlockSpec(shape, lambda t: (0,) * len(shape))

    ws2 = (2 * t_chunk * B * h1_dim * 4          # h1 chunk, f32, double-buffered
           + 2 * t_chunk * B * d_aud * 2         # audio chunk, bf16
           + 2 * (h1_dim * h2_pad * 2            # w2
                  + h2_pad * 4                   # b2
                  + h2_pad * d_out_pad * 2       # w3 (img part)
                  + d_aud * d_out_pad * 2        # w3 (audio part)
                  + d_out_pad * 4)               # b3
           + 2 * B * d_out_pad * 4               # output
           + B * (h1_dim + h2_pad + 2 * d_out_pad) * 4)   # scratch state
    vmem_limit2 = min(max(int(ws2 * 1.3) + (2 << 20), 32 << 20), 60 << 20)

    grid_spec = pltpu.PrefetchScalarGridSpec(
        num_scalar_prefetch=0,
        grid=(T // t_chunk,),
        in_specs=[
            pl.BlockSpec((t_chunk, B, h1_dim), lambda t: (t, 0, 0)),  # h1 chunk
            pl.BlockSpec((t_chunk, B, d_aud), lambda t: (t, 0, 0)),   # audio chunk
            full((h1_dim, h2_pad)),                                   # w2
            full((1, h2_pad)),                                        # b2
            full((h2_pad, d_out_pad)),                                # w3 (img part)
            full((d_aud, d_out_pad)),                                 # w3 (audio part)
            full((1, d_out_pad)),                                     # b3
        ],
        out_specs=pl.BlockSpec((B, d_out_pad), lambda t: (0, 0)),
        scratch_shapes=[
            pltpu.VMEM((B, h1_dim), jnp.float32),     # v1 (membrane)
            pltpu.VMEM((B, h2_pad), jnp.float32),     # v2
            pltpu.VMEM((B, d_out_pad), jnp.float32),  # v3
            pltpu.VMEM((B, d_out_pad), jnp.float32),  # spike-sum accumulator
        ],
    )

    kernel = functools.partial(_fusenet_recurrent_kernel,
                               t_chunk=t_chunk, inv_t=1.0 / T)
    # TODO(synk): on v7x add a leading "parallel" batch-chunk grid axis (needs
    # B a multiple of 16 so each half keeps 8-row sublane alignment) so the
    # second TensorCore is used, and single-buffer the constant weight specs
    # (pipeline_mode=pl.Buffered(1)) to shave their VMEM footprint.
    out_pad = pl.pallas_call(
        kernel,
        out_shape=jax.ShapeDtypeStruct((B, d_out_pad), jnp.float32),
        grid_spec=grid_spec,
        compiler_params=pltpu.CompilerParams(
            dimension_semantics=("arbitrary",),     # recurrent over time
            vmem_limit_bytes=vmem_limit2,
        ),
    )(h1, aud_bf, w2_bf, b2_p, w3_img, w3_aud, b3_p)
    return out_pad[:, :d_out]


# ---------------------------------------------------------------------------
# Pure-JAX reference mirroring the kernel numerics (bf16 MXU operands, f32 state)
# ---------------------------------------------------------------------------
def fusenet_reference(img, audio, params):
    T, B, d_img = img.shape
    audio_flat = audio.reshape(T, B, -1)
    w1, b1, w2, b2, w3, b3 = params
    h2_dim = w2.shape[1]

    img_bf = img.astype(jnp.bfloat16)
    aud_bf = audio_flat.astype(jnp.bfloat16)
    w1_bf = w1.astype(jnp.bfloat16)
    w2_bf = w2.astype(jnp.bfloat16)
    w3_bf = w3.astype(jnp.bfloat16)
    w3_img = w3_bf[:h2_dim]
    w3_aud = w3_bf[h2_dim:]

    h1 = (jnp.dot(img_bf.reshape(T * B, d_img), w1_bf,
                  preferred_element_type=jnp.float32) + b1).reshape(T, B, -1)

    def lif(v, x):
        v = (v + x) * 0.5
        s = v >= V_TH
        return jnp.where(s, V_RESET, v), s.astype(jnp.float32)

    def step(carry, inp):
        v1, v2, v3 = carry
        x1, a = inp
        v1, s1 = lif(v1, x1)
        v2, s2 = lif(v2, jnp.dot(s1.astype(jnp.bfloat16), w2_bf,
                                 preferred_element_type=jnp.float32) + b2)
        # split matmul == cat(s2, a) @ w3 exactly (mirrors the kernel)
        h3 = (jnp.dot(s2.astype(jnp.bfloat16), w3_img,
                      preferred_element_type=jnp.float32)
              + jnp.dot(a, w3_aud, preferred_element_type=jnp.float32) + b3)
        v3, s3 = lif(v3, h3)
        return (v1, v2, v3), s3

    init = (jnp.zeros((B, w1.shape[1]), jnp.float32),
            jnp.zeros((B, w2.shape[1]), jnp.float32),
            jnp.zeros((B, w3.shape[1]), jnp.float32))
    _, outs = jax.lax.scan(step, init, (h1, aud_bf))
    return outs.mean(0)


if __name__ == "__main__":
    # Small shapes consistent with the module structure.
    # (Original: D_IMG=25088, H1=4096, H2=100, D_AUD=80, D_OUT=3; the two big
    #  image dims are scaled down, the fuse pattern 100 + 80 -> 3 is kept.)
    T, B = 4, 8
    D_IMG, H1, H2, D_AUD, D_OUT = 512, 256, 100, 80, 3

    key = jax.random.PRNGKey(0)
    k_img, k_aud, k1, k2, k3, kb1, kb2, kb3 = jax.random.split(key, 8)

    img = jax.random.normal(k_img, (T, B, D_IMG), dtype=jnp.float32)
    audio = jax.random.normal(k_aud, (T, B, 4, D_AUD // 4), dtype=jnp.float32)

    # Deterministic synthetic weights, stored [in, out] (== PyTorch W.T).
    w1 = jax.random.normal(k1, (D_IMG, H1), dtype=jnp.float32) / jnp.sqrt(D_IMG)
    b1 = jax.random.normal(kb1, (H1,), dtype=jnp.float32) * 0.01
    w2 = jax.random.normal(k2, (H1, H2), dtype=jnp.float32) / jnp.sqrt(H1)
    b2 = jax.random.normal(kb2, (H2,), dtype=jnp.float32) * 0.01
    w3 = jax.random.normal(k3, (H2 + D_AUD, D_OUT), dtype=jnp.float32) / jnp.sqrt(H2 + D_AUD)
    b3 = jax.random.normal(kb3, (D_OUT,), dtype=jnp.float32) * 0.01
    params = (w1, b1, w2, b2, w3, b3)

    out = fusenet_forward(img, audio, params)
    out = jax.block_until_ready(out)

    ref = fusenet_reference(img, audio, params)
    assert out.shape == (B, D_OUT), out.shape
    assert jnp.allclose(out, ref, atol=1e-5, rtol=1e-5), (out, ref)

    print("KERNEL_OK")
</pallas_src>

<mosaic_0001>
module attributes {stable_mosaic.version = 11 : i64} {
  func.func @_fc1_matmul_kernel(%arg0: i32, %arg1: i32, %arg2: i32, %arg3: memref<32x512xbf16, #tpu.memory_space<vmem>>, %arg4: memref<512x256xbf16, #tpu.memory_space<vmem>>, %arg5: memref<1x256xf32, #tpu.memory_space<vmem>>, %arg6: memref<32x256xf32, #tpu.memory_space<vmem>>, %arg7: memref<32x256xf32, #tpu.memory_space<vmem>>) attributes {dimension_semantics = [#tpu.dimension_semantics<parallel>, #tpu.dimension_semantics<parallel>, #tpu.dimension_semantics<arbitrary>], iteration_bounds = array<i64: 1, 1, 1>, scalar_prefetch = 0 : i64, scratch_operands = 1 : i64, tpu.core_type = #tpu.core_type<tc>, window_params = [{transform_indices = @transform_0, window_bounds = array<i64: 32, 512>}, {transform_indices = @transform_1, window_bounds = array<i64: 512, 256>}, {transform_indices = @transform_2, window_bounds = array<i64: 1, 256>}, {transform_indices = @transform_3, window_bounds = array<i64: 32, 256>}]} {
    %c0_i32 = arith.constant 0 : i32
    %0 = arith.cmpi eq, %arg2, %c0_i32 : i32
    %1 = arith.extui %0 : i1 to i32
    %c0_i32_0 = arith.constant 0 : i32
    %2 = arith.cmpi ne, %1, %c0_i32_0 : i32
    scf.if %2 {
      %cst_9 = arith.constant 0.000000e+00 : f32
      %15 = vector.broadcast %cst_9 : f32 to vector<32x256xf32>
      %c0_10 = arith.constant 0 : index
      %c0_11 = arith.constant 0 : index
      %16 = vector.load %arg7[%c0_10, %c0_11] : memref<32x256xf32, #tpu.memory_space<vmem>>, vector<32x256xf32>
      tpu.vector_store %arg7[%c0_10, %c0_11], %15 {strides = array<i32>} : memref<32x256xf32, #tpu.memory_space<vmem>>, vector<32x256xf32>,
    } else {
    }
    %c512_i32 = arith.constant 512 : i32
    %3 = arith.muli %arg2, %c512_i32 : i32
    %4 = tpu.assume_multiple %3, 512 : i32
    %c0 = arith.constant 0 : index
    %c0_1 = arith.constant 0 : index
    %5 = vector.load %arg7[%c0, %c0_1] : memref<32x256xf32, #tpu.memory_space<vmem>>, vector<32x256xf32>
    %c0_2 = arith.constant 0 : index
    %6 = arith.index_cast %4 : i32 to index
    %7 = vector.load %arg3[%c0_2, %6] : memref<32x512xbf16, #tpu.memory_space<vmem>>, vector<32x512xbf16>
    %c0_3 = arith.constant 0 : index
    %c0_4 = arith.constant 0 : index
    %8 = vector.load %arg4[%c0_3, %c0_4] : memref<512x256xbf16, #tpu.memory_space<vmem>>, vector<512x256xbf16>
    %cst = arith.constant dense<0.000000e+00> : vector<32x256xf32>
    %9 = tpu.matmul %7, %8, %cst {dimension_numbers = #tpu.dot_dimension_numbers<[1], [0], [0], [1], [0, 0, 1, 1], [], []>} : vector<32x512xbf16>, vector<512x256xbf16>, vector<32x256xf32> -> vector<32x256xf32>
    %10 = arith.addf %5, %9 : vector<32x256xf32>
    %c0_5 = arith.constant 0 : index
    %c0_6 = arith.constant 0 : index
    %11 = vector.load %arg7[%c0_5, %c0_6] : memref<32x256xf32, #tpu.memory_space<vmem>>, vector<32x256xf32>
    tpu.vector_store %arg7[%c0_5, %c0_6], %10 {strides = array<i32>} : memref<32x256xf32, #tpu.memory_space<vmem>>, vector<32x256xf32>,
    %c0_i32_7 = arith.constant 0 : i32
    %12 = arith.cmpi eq, %arg2, %c0_i32_7 : i32
    %13 = arith.extui %12 : i1 to i32
    %c0_i32_8 = arith.constant 0 : i32
    %14 = arith.cmpi ne, %13, %c0_i32_8 : i32
    scf.if %14 {
      %c0_9 = arith.constant 0 : index
      %c0_10 = arith.constant 0 : index
      %15 = vector.load %arg7[%c0_9, %c0_10] : memref<32x256xf32, #tpu.memory_space<vmem>>, vector<32x256xf32>
      %c0_11 = arith.constant 0 : index
      %c0_12 = arith.constant 0 : index
      %16 = vector.load %arg5[%c0_11, %c0_12] : memref<1x256xf32, #tpu.memory_space<vmem>>, vector<1x256xf32>
      %17 = vector.broadcast %16 : vector<1x256xf32> to vector<32x256xf32>
      %18 = arith.addf %15, %17 : vector<32x256xf32>
      %c0_13 = arith.constant 0 : index
      %c0_14 = arith.constant 0 : index
      %19 = vector.load %arg6[%c0_13, %c0_14] : memref<32x256xf32, #tpu.memory_space<vmem>>, vector<32x256xf32>
      tpu.vector_store %arg6[%c0_13, %c0_14], %18 {strides = array<i32>} : memref<32x256xf32, #tpu.memory_space<vmem>>, vector<32x256xf32>,
    } else {
    }
    return
  }
  func.func @transform_0(%arg0: i32, %arg1: i32, %arg2: i32) -> (i32, i32) {
    %c0_i32 = arith.constant 0 : i32
    %c0_i32_0 = arith.constant 0 : i32
    return %arg0, %c0_i32 : i32, i32
  }
  func.func @transform_1(%arg0: i32, %arg1: i32, %arg2: i32) -> (i32, i32) {
    %c0_i32 = arith.constant 0 : i32
    return %arg2, %arg1 : i32, i32
  }
  func.func @transform_2(%arg0: i32, %arg1: i32, %arg2: i32) -> (i32, i32) {
    %c0_i32 = arith.constant 0 : i32
    %c0_i32_0 = arith.constant 0 : i32
    return %c0_i32, %arg1 : i32, i32
  }
  func.func @transform_3(%arg0: i32, %arg1: i32, %arg2: i32) -> (i32, i32) {
    %c0_i32 = arith.constant 0 : i32
    return %arg0, %arg1 : i32, i32
  }
}

</mosaic_0001>

<bundles_post_ra>
// kernel: tpu_custom_call.1
= control target key start
LH: loop header
LB: loop body
LE: loop exit
PB: predicated region body
PF: predicated region fallthrough
CT: control target
= control target key end

     0   :  { %8 = vsyncpa [#allocation4], 0  ;;  %s979_s0 = inlined_call_operand.hbm [shape: bf16[32,512], index: 0, kind: input, shape index: {}]   ;;  %s980_s1 = inlined_call_operand.hbm [shape: bf16[512,256], index: 1, kind: input, shape index: {}]   ;;  %s981_s2 = inlined_call_operand.vmem [shape: f32[1,256], index: 2, kind: input, shape index: {}]   ;;  %s982_s3 = inlined_call_operand.hbm [shape: f32[32,256], index: 3, kind: output, shape index: {}]  }
   0x1   :  { %9 = vsyncpa [#allocation7], 0 }
   0x2   :  { %10 = vsyncpa [#allocation5], 0  ;;  %s934_s12 = smov [#allocation3]  }
   0x3   :  { %s16_s13 = sshll.u32 %s934_s12, 4  ;;  %s17_s13 = int_to_ptr.vmem [resolvable:$true] %s16_s13 }
   0x4   :  { %s876_s14 = scalar_lea.vmem %s17_s13, 1024  ;;  %p881_p1 = scmp.lt.s32.totalorder %s17_s13, %s17_s13 }
   0x5   :  { %p877_p0 = scmp.ne.s32.totalorder %s17_s13, %s876_s14  ;;  %p882_p2 = scmp.lt.s32.totalorder %s876_s14, %s876_s14 }
   0x7   :  { %p883_p3 = por %p882_p2, %p881_p1 }
   0x9   :  { %p884_p4 = pnand %p883_p3, %p877_p0 }
   0xb   :  { %887 = shalt.err (!%p884_p4)
}
   0xc   :  { %s935_s15 = smov 256   ;;  %s936_s16 = smov 16  }
   0xd   :  { %22 = dma.hbm_to_vmem [thread:$0]  %s979_s0, 1024, %s17_s13, [#allocation4], %s935_s15, %s935_s15, %s936_s16  }
   0xe   :  { %s937_s19 = smov [#allocation6]  }
   0xf   :  { %s28_s20 = sshll.u32 %s937_s19, 4  ;;  %s29_s20 = int_to_ptr.vmem [resolvable:$true] %s28_s20 }
  0x10   :  { %s896_s21 = scalar_lea.vmem %s29_s20, 8192  ;;  %p901_p6 = scmp.lt.s32.totalorder %s29_s20, %s29_s20 }
  0x11   :  { %p897_p5 = scmp.ne.s32.totalorder %s29_s20, %s896_s21  ;;  %p902_p7 = scmp.lt.s32.totalorder %s896_s21, %s896_s21 }
  0x13   :  { %p903_p8 = por %p902_p7, %p901_p6 }
  0x15   :  { %p904_p9 = pnand %p903_p8, %p897_p5 }
  0x17   :  { %907 = shalt.err (!%p904_p9)
}
  0x18   :  { %s938_s22 = smov 128   ;;  %s939_s23 = smov 8  }
  0x19   :  { %34 = dma.hbm_to_vmem [thread:$0]  %s980_s1, 8192, %s29_s20, [#allocation7], %s938_s22, %s938_s22, %s939_s23  }
  0x1a   :  { %928 = dma.done.wait [#allocation4], 1024  }
  0x1b   :  { %929 = vsyncadd [#allocation4], 4294966272 }
  0x1c   :  { %930 = dma.done.wait [#allocation7], 8192  }
  0x1d   :  { %931 = vsyncadd [#allocation7], 4294959104  ;;  %v760_v0 = vld [vmem:[#allocation6 + $0x74] ss:$8 sps:$4 sm:$0xff]   ;;  %v764_v2 = vld [vmem:[#allocation6 + $0x70] ss:$8 sps:$4 sm:$0xff]  }
  0x1e   :  { %v762_v1 = vld [vmem:[#allocation6 + $0x174] ss:$8 sps:$4 sm:$0xff]   ;;  %500 = vmatprep.subr.bf16.mxu0 %v760_v0  ;;  %v765_v3 = vld [vmem:[#allocation6 + $0x170] ss:$8 sps:$4 sm:$0xff]   ;;  %v766_v4 = vld [vmem:[#allocation6 + $0x64] ss:$8 sps:$4 sm:$0xff]  }
  0x1f   :  { %553 = vmatprep.subr.bf16.mxu1 %v762_v1  ;;  %501 = vmatpush1.bf16.msra.mxu0 %v764_v2  ;;  %v768_v5 = vld [vmem:[#allocation6 + $0x164] ss:$8 sps:$4 sm:$0xff]   ;;  %v770_v6 = vld [vmem:[#allocation6 + $0x60] ss:$8 sps:$4 sm:$0xff]   ;;  %v772_v8 = vld [vmem:[#allocation6 + $0x54] ss:$8 sps:$4 sm:$0xff]  }
  0x20   :  { %554 = vmatpush1.bf16.msra.mxu1 %v765_v3  ;;  %502 = vmatprep.subr.bf16.mxu0 %v766_v4  ;;  %v771_v7 = vld [vmem:[#allocation6 + $0x160] ss:$8 sps:$4 sm:$0xff]   ;;  %v774_v9 = vld [vmem:[#allocation6 + $0x154] ss:$8 sps:$4 sm:$0xff]   ;;  %v776_v10 = vld [vmem:[#allocation6 + $0x50] ss:$8 sps:$4 sm:$0xff]  }
  0x21   :  { %555 = vmatprep.subr.bf16.mxu1 %v768_v5  ;;  %v777_v11 = vld [vmem:[#allocation6 + $0x150] ss:$8 sps:$4 sm:$0xff]   ;;  %v778_v12 = vld [vmem:[#allocation6 + $0x44] ss:$8 sps:$4 sm:$0xff]   ;;  %v782_v14 = vld [vmem:[#allocation6 + $0x40] ss:$8 sps:$4 sm:$0xff]  }
  0x22   :  { %v780_v13 = vld [vmem:[#allocation6 + $0x144] ss:$8 sps:$4 sm:$0xff]   ;;  %v783_v15 = vld [vmem:[#allocation6 + $0x140] ss:$8 sps:$4 sm:$0xff]   ;;  %v784_v16 = vld [vmem:[#allocation6 + $0x34] ss:$8 sps:$4 sm:$0xff]  }
  0x23   :  { %503 = vmatpush1.bf16.msra.mxu0 %v770_v6  ;;  %v786_v17 = vld [vmem:[#allocation6 + $0x134] ss:$8 sps:$4 sm:$0xff]   ;;  %v788_v18 = vld [vmem:[#allocation6 + $0x30] ss:$8 sps:$4 sm:$0xff]   ;;  %v790_v20 = vld [vmem:[#allocation6 + $0x24] ss:$8 sps:$4 sm:$0xff]  }
  0x24   :  { %556 = vmatpush1.bf16.msra.mxu1 %v771_v7  ;;  %504 = vmatprep.subr.bf16.mxu0 %v772_v8  ;;  %v789_v19 = vld [vmem:[#allocation6 + $0x130] ss:$8 sps:$4 sm:$0xff]   ;;  %v792_v21 = vld [vmem:[#allocation6 + $0x124] ss:$8 sps:$4 sm:$0xff]   ;;  %v794_v22 = vld [vmem:[#allocation6 + $0x20] ss:$8 sps:$4 sm:$0xff]   ;;  %v635_v8 = vlaneseq }
  0x25   :  { %557 = vmatprep.subr.bf16.mxu1 %v774_v9  ;;  %v795_v23 = vld [vmem:[#allocation6 + $0x120] ss:$8 sps:$4 sm:$0xff]   ;;  %v796_v24 = vld [vmem:[#allocation6 + $0x14] ss:$8 sps:$4 sm:$0xff]   ;;  %v800_v26 = vld [vmem:[#allocation6 + $0x10] ss:$8 sps:$4 sm:$0xff]  }
  0x26   :  { %v798_v25 = vld [vmem:[#allocation6 + $0x114] ss:$8 sps:$4 sm:$0xff]   ;;  %v801_v27 = vld [vmem:[#allocation6 + $0x110] ss:$8 sps:$4 sm:$0xff]   ;;  %v802_v28 = vld [vmem:[#allocation6 + $0x4] ss:$8 sps:$4 sm:$0xff]  }
  0x27   :  { %505 = vmatpush1.bf16.msra.mxu0 %v776_v10  ;;  %v804_v29 = vld [vmem:[#allocation6 + $0x104] ss:$8 sps:$4 sm:$0xff]   ;;  %v806_v30 = vld [vmem:[#allocation6] ss:$8 sps:$4 sm:$0xff]   ;;  %v808_v32 = vld [vmem:[#allocation6 + $0xf4] ss:$8 sps:$4 sm:$0xff]  }
  0x28   :  { %558 = vmatpush1.bf16.msra.mxu1 %v777_v11  ;;  %506 = vmatprep.subr.bf16.mxu0 %v778_v12  ;;  %v807_v31 = vld [vmem:[#allocation6 + $0x100] ss:$8 sps:$4 sm:$0xff]   ;;  %v810_v33 = vld [vmem:[#allocation6 + $0x1f4] ss:$8 sps:$4 sm:$0xff]   ;;  %v812_v34 = vld [vmem:[#allocation6 + $0xf0] ss:$8 sps:$4 sm:$0xff]  }
  0x29   :  { %559 = vmatprep.subr.bf16.mxu1 %v780_v13  ;;  %v813_v35 = vld [vmem:[#allocation6 + $0x1f0] ss:$8 sps:$4 sm:$0xff]   ;;  %v814_v36 = vld [vmem:[#allocation6 + $0xe4] ss:$8 sps:$4 sm:$0xff]   ;;  %v818_v38 = vld [vmem:[#allocation6 + $0xe0] ss:$8 sps:$4 sm:$0xff]  }
  0x2a   :  { %v816_v37 = vld [vmem:[#allocation6 + $0x1e4] ss:$8 sps:$4 sm:$0xff]   ;;  %v819_v39 = vld [vmem:[#allocation6 + $0x1e0] ss:$8 sps:$4 sm:$0xff]   ;;  %v820_v40 = vld [vmem:[#allocation6 + $0xd4] ss:$8 sps:$4 sm:$0xff]  }
  0x2b   :  { %507 = vmatpush1.bf16.msra.mxu0 %v782_v14  ;;  %v822_v41 = vld [vmem:[#allocation6 + $0x1d4] ss:$8 sps:$4 sm:$0xff]   ;;  %v824_v42 = vld [vmem:[#allocation6 + $0xd0] ss:$8 sps:$4 sm:$0xff]   ;;  %v826_v44 = vld [vmem:[#allocation6 + $0xc4] ss:$8 sps:$4 sm:$0xff]  }
  0x2c   :  { %560 = vmatpush1.bf16.msra.mxu1 %v783_v15  ;;  %508 = vmatprep.subr.bf16.mxu0 %v784_v16  ;;  %v825_v43 = vld [vmem:[#allocation6 + $0x1d0] ss:$8 sps:$4 sm:$0xff]   ;;  %v828_v45 = vld [vmem:[#allocation6 + $0x1c4] ss:$8 sps:$4 sm:$0xff]   ;;  %v830_v46 = vld [vmem:[#allocation6 + $0xc0] ss:$8 sps:$4 sm:$0xff]  }
  0x2d   :  { %561 = vmatprep.subr.bf16.mxu1 %v786_v17  ;;  %v831_v47 = vld [vmem:[#allocation6 + $0x1c0] ss:$8 sps:$4 sm:$0xff]   ;;  %v832_v48 = vld [vmem:[#allocation6 + $0xb4] ss:$8 sps:$4 sm:$0xff]   ;;  %v836_v52 = vld [vmem:[#allocation6 + $0xb0] ss:$8 sps:$4 sm:$0xff]  }
  0x2e   :  { %v858_v49 = vld [vmem:[#allocation3 + $0x4] ss:$16 sps:$4 sm:$0xff]   ;;  %v861_v51 = vld [vmem:[#allocation3 + $0xc] ss:$16 sps:$4 sm:$0xff]   ;;  %v837_v53 = vld [vmem:[#allocation6 + $0x1b0] ss:$8 sps:$4 sm:$0xff]  }
  0x2f   :  { %509 = vmatpush1.bf16.msra.mxu0 %v788_v18  ;;  %v834_v50 = vld [vmem:[#allocation6 + $0x1b4] ss:$8 sps:$4 sm:$0xff]   ;;  %532 = vmatprep.mubr.bf16.mxu0 %v858_v49  ;;  %v838_v54 = vld [vmem:[#allocation6 + $0xa4] ss:$8 sps:$4 sm:$0xff]   ;;  %v842_v56 = vld [vmem:[#allocation6 + $0xa0] ss:$8 sps:$4 sm:$0xff]  }
  0x30   :  { %562 = vmatpush1.bf16.msra.mxu1 %v789_v19  ;;  %510 = vmatprep.subr.bf16.mxu0 %v790_v20  ;;  %v840_v55 = vld [vmem:[#allocation6 + $0x1a4] ss:$8 sps:$4 sm:$0xff]   ;;  %v843_v57 = vld [vmem:[#allocation6 + $0x1a0] ss:$8 sps:$4 sm:$0xff]   ;;  %v844_v58 = vld [vmem:[#allocation6 + $0x94] ss:$8 sps:$4 sm:$0xff]  }
  0x31   :  { %563 = vmatprep.subr.bf16.mxu1 %v792_v21  ;;  %585 = vmatprep.mubr.bf16.mxu1 %v861_v51  ;;  %v846_v59 = vld [vmem:[#allocation6 + $0x194] ss:$8 sps:$4 sm:$0xff]   ;;  %v848_v60 = vld [vmem:[#allocation6 + $0x90] ss:$8 sps:$4 sm:$0xff]   ;;  %v850_v62 = vld [vmem:[#allocation6 + $0x84] ss:$8 sps:$4 sm:$0xff]  }
  0x32   :  { %v849_v61 = vld [vmem:[#allocation6 + $0x190] ss:$8 sps:$4 sm:$0xff]   ;;  %v852_v63 = vld [vmem:[#allocation6 + $0x184] ss:$8 sps:$4 sm:$0xff]   ;;  %v854_v0 = vld [vmem:[#allocation6 + $0x80] ss:$8 sps:$4 sm:$0xff]  }
  0x33   :  { %511 = vmatpush1.bf16.msra.mxu0 %v794_v22  ;;  %v855_v1 = vld [vmem:[#allocation6 + $0x180] ss:$8 sps:$4 sm:$0xff]   ;;  %v862_v4 = vld [vmem:[#allocation3 + $0x24] ss:$16 sps:$4 sm:$0xff]   ;;  %v864_v5 = vld [vmem:[#allocation3 + $0x2c] ss:$16 sps:$4 sm:$0xff]  }
  0x34   :  { %564 = vmatpush1.bf16.msra.mxu1 %v795_v23  ;;  %512 = vmatprep.subr.bf16.mxu0 %v796_v24  ;;  %v856_v2 = vld [vmem:[#allocation3] ss:$16 sps:$4 sm:$0xff]   ;;  %v859_v3 = vld [vmem:[#allocation3 + $0x8] ss:$16 sps:$4 sm:$0xff]   ;;  %v636_v9 = vshrl.u32 %v635_v8, 7 }
  0x35   :  { %565 = vmatprep.subr.bf16.mxu1 %v798_v25  ;;  %v866_v6 = vld [vmem:[#allocation3 + $0x20] ss:$16 sps:$4 sm:$0xff]   ;;  %v867_v7 = vld [vmem:[#allocation3 + $0x28] ss:$16 sps:$4 sm:$0xff]  }
  0x36   :  { %v637_v10 = vsub.s32 0, %v636_v9  ;;  %v633_v11 = vld [vmem:[%s981_s2] sm:$0x3]  ;;  %v641_v12 = vsub.s32 1, %v636_v9  ;;  %s940_s2 = smov [#allocation8]  }
  0x37   :  { %513 = vmatpush1.bf16.msra.mxu0 %v800_v26  ;;  %s666_s26 = sshll.u32 %s940_s2, 4  ;;  %s667_s26 = int_to_ptr.vmem [resolvable:$true] %s666_s26 }
  0x38   :  { %566 = vmatpush1.bf16.msra.mxu1 %v801_v27  ;;  %514 = vmatprep.subr.bf16.mxu0 %v802_v28  ;;  %v638_v13 = vrot.slane %v633_v11, %v637_v10  ;;  %v642_v17 = vrot.slane %v633_v11, %v641_v12  ;;  %s908_s27 = scalar_lea.vmem %s667_s26, 1024  ;;  %p913_p11 = scmp.lt.s32.totalorder %s667_s26, %s667_s26 }
  0x39   :  { %567 = vmatprep.subr.bf16.mxu1 %v804_v29  ;;  %p909_p10 = scmp.ne.s32.totalorder %s667_s26, %s908_s27  ;;  %p914_p12 = scmp.lt.s32.totalorder %s908_s27, %s908_s27 }
  0x3b   :  { %515 = vmatpush1.bf16.msra.mxu0 %v806_v30  ;;  %p915_p13 = por %p914_p12, %p913_p11 }
  0x3c   :  { %568 = vmatpush1.bf16.msra.mxu1 %v807_v31  ;;  %516 = vmatprep.subr.bf16.mxu0 %v808_v32 }
  0x3d   :  { %569 = vmatprep.subr.bf16.mxu1 %v810_v33  ;;  %p916_p0 = pnand %p915_p13, %p909_p10 }
  0x3f   :  { %517 = vmatpush2.bf16.msra.mxu0 %v812_v34 }
  0x40   :  { %570 = vmatpush2.bf16.msra.mxu1 %v813_v35  ;;  %518 = vmatprep.subr.bf16.mxu0 %v814_v36 }
  0x41   :  { %571 = vmatprep.subr.bf16.mxu1 %v816_v37 }
  0x43   :  { %519 = vmatpush2.bf16.msra.mxu0 %v818_v38 }
  0x44   :  { %572 = vmatpush2.bf16.msra.mxu1 %v819_v39  ;;  %520 = vmatprep.subr.bf16.mxu0 %v820_v40 }
  0x45   :  { %573 = vmatprep.subr.bf16.mxu1 %v822_v41 }
  0x47   :  { %521 = vmatpush2.bf16.msra.mxu0 %v824_v42 }
  0x48   :  { %574 = vmatpush2.bf16.msra.mxu1 %v825_v43  ;;  %522 = vmatprep.subr.bf16.mxu0 %v826_v44 }
  0x49   :  { %575 = vmatprep.subr.bf16.mxu1 %v828_v45 }
  0x4b   :  { %523 = vmatpush2.bf16.msra.mxu0 %v830_v46 }
  0x4c   :  { %576 = vmatpush2.bf16.msra.mxu1 %v831_v47  ;;  %524 = vmatprep.subr.bf16.mxu0 %v832_v48 }
  0x4d   :  { %577 = vmatprep.subr.bf16.mxu1 %v834_v50 }
  0x4f   :  { %525 = vmatpush2.bf16.msra.mxu0 %v836_v52 }
  0x50   :  { %578 = vmatpush2.bf16.msra.mxu1 %v837_v53  ;;  %526 = vmatprep.subr.bf16.mxu0 %v838_v54 }
  0x51   :  { %579 = vmatprep.subr.bf16.mxu1 %v840_v55 }
  0x53   :  { %527 = vmatpush2.bf16.msra.mxu0 %v842_v56 }
  0x54   :  { %580 = vmatpush2.bf16.msra.mxu1 %v843_v57  ;;  %528 = vmatprep.subr.bf16.mxu0 %v844_v58 }
  0x55   :  { %581 = vmatprep.subr.bf16.mxu1 %v846_v59 }
  0x57   :  { %529 = vmatpush2.bf16.msra.mxu0 %v848_v60 }
  0x58   :  { %582 = vmatpush2.bf16.msra.mxu1 %v849_v61  ;;  %530 = vmatprep.subr.bf16.mxu0 %v850_v62 }
  0x59   :  { %583 = vmatprep.subr.bf16.mxu1 %v852_v63 }
  0x5b   :  { %531 = vmatpush2.bf16.msra.mxu0 %v854_v0 }
  0x5c   :  { %584 = vmatpush2.bf16.msra.mxu1 %v855_v1 }
  0x5e   :  { %533 = vmatmul.mubr.bf16.vlgmr.msra.gmra.mxu0 %v856_v2 }
  0x5f   :  { %586 = vmatmul.mubr.bf16.vlgmr.msra.gmra.mxu1 %v859_v3  ;;  %542 = vmatprep.mubr.bf16.mxu0 %v862_v4 }
  0x60   :  { %595 = vmatprep.mubr.bf16.mxu1 %v864_v5 }
  0x66   :  { %543 = vmatmul.mubr.bf16.gmra.mxu0 %v866_v6 }
  0x67   :  { %596 = vmatmul.mubr.bf16.gmra.mxu1 %v867_v7 }
 0x11e   :  { %v534_v14 = vpop.f32.mrf.mxu0 }
 0x11f   :  { %v587_v15 = vpop.f32.mrf.mxu1 }
 0x120   :  { %v588_v16 = vadd.f32 %v587_v15, %v534_v14  ;;  %v536_v18 = vpop.f32.mrf.mxu0 }
 0x121   :  { %v589_v19 = vpop.f32.mrf.mxu1 }
 0x122   :  { %v645_v20 = vadd.f32 %v638_v13, %v588_v16  ;;  %v590_v21 = vadd.f32 %v589_v19, %v536_v18  ;;  %v538_v22 = vpop.f32.mrf.mxu0 }
 0x123   :  { %v591_v23 = vpop.f32.mrf.mxu1 }
 0x124   :  { %653 = vst [vmem:[#allocation8] sm:$0xff] %v645_v20  ;;  %v646_v24 = vadd.f32 %v642_v17, %v590_v21  ;;  %v592_v25 = vadd.f32 %v591_v23, %v538_v22  ;;  %v540_v26 = vpop.f32.mrf.mxu0 }
 0x125   :  { %v593_v27 = vpop.f32.mrf.mxu1 }
 0x126   :  { %654 = vst [vmem:[#allocation8 + $0x8] sm:$0xff] %v646_v24  ;;  %v647_v28 = vadd.f32 %v638_v13, %v592_v25  ;;  %v594_v29 = vadd.f32 %v593_v27, %v540_v26  ;;  %v544_v30 = vpop.f32.mrf.mxu0 }
 0x127   :  { %v597_v31 = vpop.f32.mrf.mxu1 }
 0x128   :  { %655 = vst [vmem:[#allocation8 + $0x10] sm:$0xff] %v647_v28  ;;  %v648_v32 = vadd.f32 %v642_v17, %v594_v29  ;;  %v598_v33 = vadd.f32 %v597_v31, %v544_v30  ;;  %v546_v34 = vpop.f32.mrf.mxu0 }
 0x129   :  { %v599_v35 = vpop.f32.mrf.mxu1 }
 0x12a   :  { %656 = vst [vmem:[#allocation8 + $0x18] sm:$0xff] %v648_v32  ;;  %v649_v36 = vadd.f32 %v638_v13, %v598_v33  ;;  %v600_v37 = vadd.f32 %v599_v35, %v546_v34  ;;  %v548_v38 = vpop.f32.mrf.mxu0 }
 0x12b   :  { %v601_v39 = vpop.f32.mrf.mxu1 }
 0x12c   :  { %657 = vst [vmem:[#allocation8 + $0x20] sm:$0xff] %v649_v36  ;;  %v650_v40 = vadd.f32 %v642_v17, %v600_v37  ;;  %v602_v41 = vadd.f32 %v601_v39, %v548_v38  ;;  %v550_v42 = vpop.f32.mrf.mxu0 }
 0x12d   :  { %v603_v43 = vpop.f32.mrf.mxu1 }
 0x12e   :  { %658 = vst [vmem:[#allocation8 + $0x28] sm:$0xff] %v650_v40  ;;  %v651_v44 = vadd.f32 %v638_v13, %v602_v41  ;;  %v604_v45 = vadd.f32 %v603_v43, %v550_v42 }
 0x130   :  { %659 = vst [vmem:[#allocation8 + $0x30] sm:$0xff] %v651_v44  ;;  %v652_v46 = vadd.f32 %v642_v17, %v604_v45 }
 0x132   :  { %660 = vst [vmem:[#allocation8 + $0x38] sm:$0xff] %v652_v46 }
 0x133   :  { %919 = shalt.err (!%p916_p0)
}
 0x134   :  { %672 = dma.vmem_to_hbm [thread:$0]  %s667_s26, 1024, %s982_s3, [#allocation5], %s935_s15, %s935_s15, %s936_s16  }
 0x135   :  { %932 = dma.done.wait [#allocation5], 1024  }
 0x136   :  { %933 = vsyncadd [#allocation5], 4294966272 }
 0x137   :  { %676 = vsyncpa [#allocation4], 1 }
 0x138   :  { %677 = vsyncpa [#allocation7], 1 }
 0x139   :  { %678 = vsyncpa [#allocation5], 1 }

</bundles_post_ra>
